<compile_context>
chip_gen: v6e
topology: v6e:2x2x1
jax: 0.10.0
libtpu: 0.0.40
codegen_flags: <defaults>
</compile_context>

<pallas_src>
import jax
import jax.numpy as jnp
from jax.experimental import pallas as pl
from jax.experimental.pallas import tpu as pltpu


def _round_up(x, m):
    return ((x + m - 1) // m) * m


# ----------------------------- init-time kernel -----------------------------
def _tonal_mix_kernel(chroma_ref, noises_ref, out_ref):
    # chroma_ref: (tT, Cp)  -- (frames, bins), already transposed: standard (M, K) lhs
    # noises_ref: (Cp, tS)
    # out_ref   : (tT, tS)
    w = chroma_ref[...]                                                   # f32
    inv = pl.reciprocal(jnp.sum(w, axis=1, keepdims=True), approx=True)   # EUP slot (free-ish)
    w = w * inv                                                           # normalized weights
    out_ref[...] = jnp.dot(
        w, noises_ref[...], preferred_element_type=jnp.float32
    ).astype(out_ref.dtype)


def build_tonal_noise(chroma, noises_flat, *, tT=256, tS=2048, out_dtype=jnp.float32):
    """chroma: (C, T) f32, noises_flat: (C, S) f32 -> (T, S) out_dtype.

    Default tiles (256, 2048): 2 MiB f32 output tile; with double-buffered
    inputs/outputs the working set stays well under the 16 MiB scoped-VMEM
    default of v5e (and thus v6e / v7x as well).
    """
    chroma = chroma.astype(jnp.float32)
    noises_flat = noises_flat.astype(jnp.float32)
    C, T = chroma.shape
    C2, S = noises_flat.shape
    assert C == C2
    assert tT % 8 == 0 and tS % 128 == 0

    # Pad the contraction dim to the f32 sublane grain; zero rows/cols are exactly neutral.
    Cp = _round_up(C, 8)

    # Effective tiles: full dim if it fits one block, else pad the dim to a tile multiple.
    if T <= tT:
        tT_eff, Tp = T, T
    else:
        tT_eff, Tp = tT, _round_up(T, tT)
    if S <= tS:
        tS_eff, Sp = S, S
    else:
        tS_eff, Sp = tS, _round_up(S, tS)

    # Host-side, one-time, tiny: transpose + pad so the kernel needs no in-kernel relayout.
    chroma_t = jnp.pad(chroma.T, ((0, 0), (0, Cp - C)))                   # zero padded bins
    if Tp != T:
        # padded frames get all-one weights -> finite garbage rows, sliced off below
        chroma_t = jnp.pad(chroma_t, ((0, Tp - T), (0, 0)), constant_values=1.0)
    noises_p = jnp.pad(noises_flat, ((0, Cp - C), (0, Sp - S)))

    grid = (Tp // tT_eff, Sp // tS_eff)
    out = pl.pallas_call(
        _tonal_mix_kernel,
        out_shape=jax.ShapeDtypeStruct((Tp, Sp), out_dtype),
        grid=grid,
        in_specs=[
            pl.BlockSpec((tT_eff, Cp), lambda i, j: (i, 0)),
            pl.BlockSpec((Cp, tS_eff), lambda i, j: (0, j)),
        ],
        out_specs=pl.BlockSpec((tT_eff, tS_eff), lambda i, j: (i, j)),
        compiler_params=pltpu.CompilerParams(
            dimension_semantics=("parallel", "parallel")),
    )(chroma_t, noises_p)

    if Tp != T or Sp != S:
        out = out[:T, :S]
    return out


# ----------------------------- forward-time kernel ---------------------------
def _select_kernel(idx_ref, noise_ref, out_ref):
    # The scalar-prefetched index is consumed by the BlockSpec index_map; the body
    # only sees the single selected (1, S) row already resident in VMEM.
    del idx_ref
    out_ref[...] = noise_ref[...]


def make_frame_selector(T, S, dtype):
    sel = pl.pallas_call(
        _select_kernel,
        out_shape=jax.ShapeDtypeStruct((1, S), dtype),
        grid_spec=pltpu.PrefetchScalarGridSpec(
            num_scalar_prefetch=1,
            grid=(1,),
            # Only the requested row is DMA'd (S*dtype bytes/call), not the whole (T, S).
            in_specs=[pl.BlockSpec((1, S), lambda i, idx: (idx[0], 0))],
            out_specs=pl.BlockSpec((1, S), lambda i, idx: (0, 0)),
        ),
    )
    # jit so repeated __call__s reuse the cached executable.
    return jax.jit(lambda noise, idx: sel(idx, noise))


# ------------------------------ module wrapper -------------------------------
class TonalNoise:
    def __init__(self, chroma_or_tonnetz, size, *, noise_key=None,
                 buffer_dtype=jnp.float32):
        if noise_key is None:
            noise_key = jax.random.PRNGKey(42)
        chroma = jnp.asarray(chroma_or_tonnetz, dtype=jnp.float32)
        C, T = chroma.shape
        # torch.randn(C, 1, 1, size, size) flattened to (C, size*size)
        noises = jax.random.normal(noise_key, (C, size * size), dtype=jnp.float32)
        self.size = size
        # buffer 'noise': (T, size*size)  (== (T, 1, size, size), channel squeezed)
        # buffer_dtype=jnp.bfloat16 halves HBM traffic of both kernels if desired.
        self.noise = build_tonal_noise(chroma, noises, out_dtype=buffer_dtype)
        self._select = make_frame_selector(T, size * size, self.noise.dtype)
        self.index = 0

    def __call__(self):
        idx = jnp.asarray([self.index], dtype=jnp.int32)
        frame = self._select(self.noise, idx)                       # (1, S)
        self.index += 1
        return frame.reshape(1, 1, self.size, self.size)            # (1, 1, size, size)


if __name__ == "__main__":
    key = jax.random.PRNGKey(0)
    k_chroma, _ = jax.random.split(key)

    C, T, size = 12, 20, 16     # 12 chroma bins, 20 frames, 16x16 noise images
    S = size * size
    # chroma-like features: nonnegative, strictly positive column sums
    chroma = jax.random.uniform(k_chroma, (C, T), dtype=jnp.float32) + 0.1

    mod = TonalNoise(chroma, size)
    out0 = mod()
    out1 = mod()
    jax.block_until_ready((out0, out1))

    # ---- pure-JAX reference ----
    noises = jax.random.normal(jax.random.PRNGKey(42), (C, S), dtype=jnp.float32)
    w_ref = chroma / chroma.sum(0, keepdims=True)                    # (C, T)
    noise_full_ref = (w_ref[:, :, None] * noises[:, None, :]).sum(0)  # (T, S)
    ref0 = noise_full_ref[0].reshape(1, 1, size, size)
    ref1 = noise_full_ref[1].reshape(1, 1, size, size)

    tol = dict(atol=5e-3, rtol=5e-3)   # pl.reciprocal(approx=True): ~1e-3 max rel error
    assert out0.shape == (1, 1, size, size) and out0.dtype == jnp.float32
    assert jnp.allclose(out0, ref0, **tol)
    assert jnp.allclose(out1, ref1, **tol)
    assert jnp.allclose(mod.noise, noise_full_ref, **tol)

    # Exercise the tiled + padded path explicitly (Tp=24 -> T padding, grid=(3, 2)).
    tiled = build_tonal_noise(chroma, noises, tT=8, tS=128)
    jax.block_until_ready(tiled)
    assert tiled.shape == (T, S)
    assert jnp.allclose(tiled, noise_full_ref, **tol)

    print("KERNEL_OK")
</pallas_src>

<mosaic_0001>
module attributes {stable_mosaic.version = 11 : i64} {
  func.func @_tonal_mix_kernel(%arg0: i32, %arg1: i32, %arg2: memref<20x16xf32, #tpu.memory_space<vmem>>, %arg3: memref<16x256xf32, #tpu.memory_space<vmem>>, %arg4: memref<20x256xf32, #tpu.memory_space<vmem>>) attributes {dimension_semantics = [#tpu.dimension_semantics<parallel>, #tpu.dimension_semantics<parallel>], iteration_bounds = array<i64: 1, 1>, scalar_prefetch = 0 : i64, scratch_operands = 0 : i64, tpu.core_type = #tpu.core_type<tc>, window_params = [{transform_indices = @transform_0, window_bounds = array<i64: 20, 16>}, {transform_indices = @transform_1, window_bounds = array<i64: 16, 256>}, {transform_indices = @transform_2, window_bounds = array<i64: 20, 256>}]} {
    %c0 = arith.constant 0 : index
    %c0_0 = arith.constant 0 : index
    %0 = vector.load %arg2[%c0, %c0_0] : memref<20x16xf32, #tpu.memory_space<vmem>>, vector<20x16xf32>
    %cst = arith.constant dense<0.000000e+00> : vector<20xf32>
    %1 = vector.multi_reduction <add>, %0, %cst [1] : vector<20x16xf32> to vector<20xf32>
    %2 = vector.shape_cast %1 : vector<20xf32> to vector<20x1xf32>
    %3 = tpu.reciprocal %2 {approx = true} : vector<20x1xf32> -> vector<20x1xf32>
    %4 = vector.broadcast %3 : vector<20x1xf32> to vector<20x16xf32>
    %5 = arith.mulf %0, %4 : vector<20x16xf32>
    %c0_1 = arith.constant 0 : index
    %c0_2 = arith.constant 0 : index
    %6 = vector.load %arg3[%c0_1, %c0_2] : memref<16x256xf32, #tpu.memory_space<vmem>>, vector<16x256xf32>
    %cst_3 = arith.constant dense<0.000000e+00> : vector<20x256xf32>
    %7 = tpu.matmul %5, %6, %cst_3 {dimension_numbers = #tpu.dot_dimension_numbers<[1], [0], [0], [1], [0, 0, 1, 1], [], []>} : vector<20x16xf32>, vector<16x256xf32>, vector<20x256xf32> -> vector<20x256xf32>
    %c0_4 = arith.constant 0 : index
    %c0_5 = arith.constant 0 : index
    %8 = vector.load %arg4[%c0_4, %c0_5] : memref<20x256xf32, #tpu.memory_space<vmem>>, vector<20x256xf32>
    tpu.vector_store %arg4[%c0_4, %c0_5], %7 {strides = array<i32>} : memref<20x256xf32, #tpu.memory_space<vmem>>, vector<20x256xf32>,
    return
  }
  func.func @transform_0(%arg0: i32, %arg1: i32) -> (i32, i32) {
    %c0_i32 = arith.constant 0 : i32
    %c0_i32_0 = arith.constant 0 : i32
    return %arg0, %c0_i32 : i32, i32
  }
  func.func @transform_1(%arg0: i32, %arg1: i32) -> (i32, i32) {
    %c0_i32 = arith.constant 0 : i32
    %c0_i32_0 = arith.constant 0 : i32
    return %c0_i32, %arg1 : i32, i32
  }
  func.func @transform_2(%arg0: i32, %arg1: i32) -> (i32, i32) {
    %c0_i32 = arith.constant 0 : i32
    return %arg0, %arg1 : i32, i32
  }
}

</mosaic_0001>

<bundles_post_ra>
// kernel: tpu_custom_call.1
= control target key start
LH: loop header
LB: loop body
LE: loop exit
PB: predicated region body
PF: predicated region fallthrough
CT: control target
= control target key end

     0   :  { %vm15_vm0 = vcmask 130048   ;;  %vm22_vm1 = vcmask 125952   ;;  %s237_s0 = inlined_call_operand.vmem [shape: f32[20,16], index: 0, kind: input, shape index: {}]   ;;  %s238_s1 = inlined_call_operand.vmem [shape: f32[16,256], index: 1, kind: input, shape index: {}]   ;;  %s239_s2 = inlined_call_operand.hbm [shape: f32[20,256], index: 2, kind: output, shape index: {}]  }
   0x1   :  { %v13_v0 = vld [vmem:[%s237_s0 + $0x8] sm:$0xff]  ;;  %v14_v1 = vld [vmem:[%s237_s0 + $0x10] sm:$0xf]  ;;  %v12_v2 = vld [vmem:[%s237_s0] sm:$0xff] }
   0x2   :  { %v19_v3 = vsel %vm15_vm0, %v13_v0, 0.0  ;;  %v23_v4 = vsel %vm22_vm1, %v14_v1, 0.0 }
   0x3   :  { %7 = vsyncpa [#allocation3], 0  ;;  %20 = vadd.xlane.f32.xlu0 %v19_v3  ;;  %24 = vadd.xlane.f32.xlu1 %v23_v4  ;;  %v16_v5 = vsel %vm15_vm0, %v12_v2, 0.0  ;;  %v35_v6 = vld [vmem:[%s238_s1 + $0x18] sm:$0xff]  ;;  %v34_v7 = vld [vmem:[%s238_s1 + $0x10] sm:$0xff]  ;;  %v189_v10 = vmov 0.0  }
   0x4   :  { %v33_v8 = vld [vmem:[%s238_s1 + $0x8] sm:$0xff]  ;;  %153 = vmatprep.subr.mxu1 %v35_v6  ;;  %v32_v9 = vld [vmem:[%s238_s1] sm:$0xff]  ;;  %115 = vmatprep.mubr.f32.mxu1 %v189_v10  ;;  %s190_s1 = smov [#allocation2]  }
   0x5   :  { %155 = vmatpush1.msra.mxu1 %v34_v7  ;;  %73 = vmatprep.subr.mxu0 %v35_v6  ;;  %s139_s22 = sshll.u32 %s190_s1, 4  ;;  %s140_s22 = int_to_ptr.vmem [resolvable:$true] %s139_s22 }
   0x6   :  { %154 = vmatprep.subr.mxu1 %v33_v8  ;;  %74 = vmatpush1.msra.mxu0 %v34_v7  ;;  %s167_s23 = scalar_lea.vmem %s140_s22, 768  ;;  %p172_p1 = scmp.lt.s32.totalorder %s140_s22, %s140_s22 }
   0x7   :  { %17 = vadd.xlane.f32.xlu0 %v16_v5  ;;  %156 = vmatpush1.msra.mxu1 %v32_v9  ;;  %p168_p0 = scmp.ne.s32.totalorder %s140_s22, %s167_s23  ;;  %p173_p2 = scmp.lt.s32.totalorder %s167_s23, %s167_s23 }
   0x8   :  { %75 = vmatprep.subr.mxu0 %v33_v8  ;;  %109 = vmatprep.mubr.f32.mxu0 %v189_v10 }
   0x9   :  { %76 = vmatpush1.msra.mxu0 %v32_v9  ;;  %p174_p3 = por %p173_p2, %p172_p1 }
   0xb   :  { %p175_p4 = pnand %p174_p3, %p168_p0 }
  0x8c   :  { %v21_v11 = vpop.xlane.xlu0 %20  ;;  %v25_v12 = vpop.xlane.xlu1 %24 }
  0x8d   :  { %161 = vrcp.f32 %v21_v11 }
  0x8e   :  { %163 = vrcp.f32 %v25_v12 }
  0x90   :  { %v18_v13 = vpop.xlane.xlu0 %17 }
  0x91   :  { %165 = vrcp.f32 %v18_v13 }
  0x9a   :  { %v162_v14 = vpop.eup %161 }
  0x9b   :  { %v164_v15 = vpop.eup %163  ;;  %v30_v16 = vmul.f32 %v162_v14, %v13_v0 }
  0x9c   :  { %v31_v17 = vmul.f32 %v164_v15, %v14_v1 }
  0x9d   :  { %151 = vmatmul.mubr.msk.f32.vlgmr.msra.gmra.mxu1 %vm15_vm0, %v30_v16 }
  0x9e   :  { %v166_v18 = vpop.eup %165  ;;  %121 = vmatprep.mubr.f32.mxu1 %v189_v10 }
  0x9f   :  { %v29_v19 = vmul.f32 %v166_v18, %v12_v2 }
  0xa1   :  { %150 = vmatmul.mubr.msk.f32.vlgmr.msra.gmra.mxu0 %vm15_vm0, %v29_v19  ;;  %152 = vmatmul.mubr.msk.f32.gmra.mxu1 %vm15_vm0, %v31_v17 }
 0x15d   :  { %v117_v20 = vpop.f32.mrf.mxu1 }
 0x15e   :  { %130 = vst [vmem:[#allocation2 + $0x10] sm:$0xff] %v117_v20 }
 0x15f   :  { %v119_v21 = vpop.f32.mrf.mxu1 }
 0x160   :  { %131 = vst [vmem:[#allocation2 + $0x18] sm:$0xff] %v119_v21 }
 0x161   :  { %v111_v22 = vpop.f32.mrf.mxu0  ;;  %v123_v23 = vpop.f32.mrf.mxu1 }
 0x162   :  { %128 = vst [vmem:[#allocation2] sm:$0xff] %v111_v22  ;;  %132 = vst [vmem:[#allocation2 + $0x20] sm:$0xf] %v123_v23 }
 0x163   :  { %v113_v24 = vpop.f32.mrf.mxu0  ;;  %v125_v25 = vpop.f32.mrf.mxu1 }
 0x164   :  { %129 = vst [vmem:[#allocation2 + $0x8] sm:$0xff] %v113_v24  ;;  %133 = vst [vmem:[#allocation2 + $0x28] sm:$0xf] %v125_v25 }
 0x165   :  { %178 = shalt.err (!%p175_p4)
}
 0x166   :  { %s191_s24 = smov 256   ;;  %s192_s25 = smov 16  }
 0x167   :  { %145 = dma.vmem_to_hbm [thread:$0]  %s140_s22, 768, %s239_s2, [#allocation3], %s191_s24, %s191_s24, %s192_s25  }
 0x168   :  { %187 = dma.done.wait [#allocation3], 768  }
 0x169   :  { %188 = vsyncadd [#allocation3], 4294966528 }
 0x16a   :  { %149 = vsyncpa [#allocation3], 1 }

</bundles_post_ra>
